<compile_context>
chip_gen: v5e
topology: v5e:2x2
jax: 0.10.0
libtpu: 0.0.40
codegen_flags: <defaults>
</compile_context>

<pallas_src>
import functools

import jax
import jax.numpy as jnp
from jax.experimental import pallas as pl
from jax.experimental.pallas import tpu as pltpu

LABSE_DIM = 384   # sentence-transformers/paraphrase-multilingual-MiniLM-L12-v2
CLIP_DIM = 768    # jinaai/jina-clip-v1 projection dim (== mlp output dim)
EPS = 1e-12       # torch.nn.functional.normalize default eps


def _round_up(x, m):
    return ((x + m - 1) // m) * m


def _pick_tile(batch, tb):
    """Largest sublane-aligned tile not exceeding `tb` that covers `batch`."""
    return int(min(tb, max(8, _round_up(batch, 8))))


# ---------------------------------------------------------------------------
# Kernels
# ---------------------------------------------------------------------------
def _mlp_norm_kernel(x_ref, w1_ref, b1_ref, w2_ref, b2_ref, o_ref):
    """labse_emb -> Linear(384,768) -> Linear(768,768) -> L2 normalize.

    Matmuls run in the weights' dtype (bf16 by default) with f32 accumulation;
    bias-add and normalization are done in f32.
    """
    x = x_ref[...].astype(w1_ref.dtype)
    h = jnp.dot(x, w1_ref[...], preferred_element_type=jnp.float32) + b1_ref[...]
    h = h.astype(w2_ref.dtype)
    y = jnp.dot(h, w2_ref[...], preferred_element_type=jnp.float32) + b2_ref[...]
    sumsq = jnp.sum(y * y, axis=-1, keepdims=True)
    # x / max(||x||, eps)  ==  x * rsqrt(max(||x||^2, eps^2))
    inv = jax.lax.rsqrt(jnp.maximum(sumsq, EPS * EPS))
    o_ref[...] = (y * inv).astype(o_ref.dtype)


def _l2norm_kernel(x_ref, o_ref):
    """torch.nn.functional.normalize(x, dim=-1, p=2)."""
    x = x_ref[...].astype(jnp.float32)
    sumsq = jnp.sum(x * x, axis=-1, keepdims=True)
    inv = jax.lax.rsqrt(jnp.maximum(sumsq, EPS * EPS))
    o_ref[...] = (x * inv).astype(o_ref.dtype)


# ---------------------------------------------------------------------------
# Wrappers
# ---------------------------------------------------------------------------
@functools.partial(jax.jit, static_argnames=("tb",))
def mlp_inference(x, w1, b1, w2, b2, *, tb=512):
    """Pallas implementation of labse_clip.inference (plain-MLP path)."""
    B, D_in = x.shape
    D_hid = w1.shape[1]
    D_out = w2.shape[1]
    tile = _pick_tile(B, tb)
    grid = (pl.cdiv(B, tile),)
    return pl.pallas_call(
        _mlp_norm_kernel,
        out_shape=jax.ShapeDtypeStruct((B, D_out), x.dtype),
        grid=grid,
        in_specs=[
            pl.BlockSpec((tile, D_in), lambda i: (i, 0)),
            pl.BlockSpec((D_in, D_hid), lambda i: (0, 0)),
            pl.BlockSpec((1, D_hid), lambda i: (0, 0)),
            pl.BlockSpec((D_hid, D_out), lambda i: (0, 0)),
            pl.BlockSpec((1, D_out), lambda i: (0, 0)),
        ],
        out_specs=pl.BlockSpec((tile, D_out), lambda i: (i, 0)),
        compiler_params=pltpu.CompilerParams(
            dimension_semantics=("parallel",)),
    )(x, w1, b1, w2, b2)


@functools.partial(jax.jit, static_argnames=("tb",))
def l2_normalize(x, *, tb=512):
    B, D = x.shape
    tile = _pick_tile(B, tb)
    grid = (pl.cdiv(B, tile),)
    return pl.pallas_call(
        _l2norm_kernel,
        out_shape=jax.ShapeDtypeStruct((B, D), x.dtype),
        grid=grid,
        in_specs=[pl.BlockSpec((tile, D), lambda i: (i, 0))],
        out_specs=pl.BlockSpec((tile, D), lambda i: (i, 0)),
        compiler_params=pltpu.CompilerParams(
            dimension_semantics=("parallel",)),
    )(x)


def labse_clip_forward(inputs, params, *, compute_dtype=jnp.bfloat16, tb=512):
    """Pallas-backed equivalent of labse_clip.forward (emb_method='mlp').

    The two inference() calls (eng + non_eng) are fused into one pallas_call by
    concatenating along the batch axis, so the 384x768 + 768x768 weights are
    DMA'd only once per forward.
    """
    org_eng_labse_emb = inputs["eng_labse_emb"]
    eng_clip_emb = l2_normalize(inputs["eng_clip_emb"], tb=tb)

    # Pre-cast weights to the matmul compute dtype (halves weight DMA for bf16);
    # biases stay f32 for the f32 bias-add/normalize path inside the kernel.
    w1 = params["w1"].astype(compute_dtype)
    w2 = params["w2"].astype(compute_dtype)
    b1 = params["b1"].astype(jnp.float32)
    b2 = params["b2"].astype(jnp.float32)

    non_eng = inputs["non_eng_labse_emb"]
    if isinstance(non_eng, list):
        new_eng_labse_emb = mlp_inference(
            org_eng_labse_emb, w1, b1, w2, b2, tb=tb)
        new_non_eng_labse_emb = None
    else:
        stacked = jnp.concatenate([org_eng_labse_emb, non_eng], axis=0)
        out = mlp_inference(stacked, w1, b1, w2, b2, tb=tb)
        n_eng = org_eng_labse_emb.shape[0]
        new_eng_labse_emb = out[:n_eng]
        new_non_eng_labse_emb = out[n_eng:]

    # TODO(synk): 'skip_conn' emb_method (labse_emb + mlp(labse_emb)) is shape-
    # inconsistent for the 384->768 layer in the reference code, so only the
    # plain-MLP path is implemented.
    return {
        "non_eng_labse_emb": non_eng,
        "new_non_eng_labse_emb": new_non_eng_labse_emb,
        "new_eng_labse_emb": new_eng_labse_emb,
        "org_eng_labse_emb": org_eng_labse_emb,
        "eng_clip_emb": eng_clip_emb,
    }


def init_params(key):
    """Deterministic Linear init matching torch.nn.Linear (U(-1/sqrt(fan_in), +))."""
    k1, k2, k3, k4 = jax.random.split(key, 4)
    bound1 = 1.0 / jnp.sqrt(LABSE_DIM)
    bound2 = 1.0 / jnp.sqrt(CLIP_DIM)
    # Stored as (in, out) so the kernel computes x @ W + b  (== torch x @ W.T + b).
    w1 = jax.random.uniform(k1, (LABSE_DIM, CLIP_DIM), jnp.float32, -bound1, bound1)
    b1 = jax.random.uniform(k2, (1, CLIP_DIM), jnp.float32, -bound1, bound1)
    w2 = jax.random.uniform(k3, (CLIP_DIM, CLIP_DIM), jnp.float32, -bound2, bound2)
    b2 = jax.random.uniform(k4, (1, CLIP_DIM), jnp.float32, -bound2, bound2)
    return {"w1": w1, "b1": b1, "w2": w2, "b2": b2}


# ---------------------------------------------------------------------------
# Main
# ---------------------------------------------------------------------------
if __name__ == "__main__":
    key = jax.random.PRNGKey(0)
    kp, ke, kc, kn = jax.random.split(key, 4)

    B = 8  # small test batch (multiples of 8 keep sublane tiles exact)
    params = init_params(kp)
    inputs = {
        "eng_labse_emb": jax.random.normal(ke, (B, LABSE_DIM), jnp.float32),
        "eng_clip_emb": jax.random.normal(kc, (B, CLIP_DIM), jnp.float32),
        "non_eng_labse_emb": jax.random.normal(kn, (B, LABSE_DIM), jnp.float32),
    }

    # Default path: bf16 matmul operands, f32 accumulate.
    outputs = labse_clip_forward(inputs, params)
    jax.block_until_ready(outputs["new_eng_labse_emb"])
    jax.block_until_ready(outputs["new_non_eng_labse_emb"])
    jax.block_until_ready(outputs["eng_clip_emb"])

    # Exact-precision path for tight validation.
    outputs_f32 = labse_clip_forward(inputs, params, compute_dtype=jnp.float32)
    jax.block_until_ready(outputs_f32["new_eng_labse_emb"])

    # Lightweight plain-JAX reference (glue, not part of the kernel).
    def ref_inference(x, p):
        h = x @ p["w1"] + p["b1"]
        y = h @ p["w2"] + p["b2"]
        n = jnp.sqrt(jnp.sum(y * y, -1, keepdims=True))
        return y / jnp.maximum(n, EPS)

    ref_eng = ref_inference(inputs["eng_labse_emb"], params)
    ref_non = ref_inference(inputs["non_eng_labse_emb"], params)

    # f32 kernel path: tight tolerance.
    assert jnp.allclose(outputs_f32["new_eng_labse_emb"], ref_eng,
                        atol=1e-5, rtol=1e-5)
    assert jnp.allclose(outputs_f32["new_non_eng_labse_emb"], ref_non,
                        atol=1e-5, rtol=1e-5)

    # bf16-operand kernel path: loose tolerance (outputs are L2-normalized,
    # components ~O(0.04), bf16 matmul error ~O(1e-4)).
    assert jnp.max(jnp.abs(outputs["new_eng_labse_emb"] - ref_eng)) < 1e-2
    assert jnp.max(jnp.abs(outputs["new_non_eng_labse_emb"] - ref_non)) < 1e-2

    ref_clip = inputs["eng_clip_emb"] / jnp.maximum(
        jnp.sqrt(jnp.sum(inputs["eng_clip_emb"] ** 2, -1, keepdims=True)), EPS)
    assert jnp.allclose(outputs["eng_clip_emb"], ref_clip, atol=1e-5, rtol=1e-5)

    print("KERNEL_OK")
</pallas_src>

<mosaic_0001>
module attributes {stable_mosaic.version = 11 : i64} {
  func.func @_l2norm_kernel(%arg0: i32, %arg1: memref<8x768xf32, #tpu.memory_space<vmem>>, %arg2: memref<8x768xf32, #tpu.memory_space<vmem>>) attributes {dimension_semantics = [#tpu.dimension_semantics<parallel>], iteration_bounds = array<i64: 1>, scalar_prefetch = 0 : i64, scratch_operands = 0 : i64, tpu.core_type = #tpu.core_type<tc>, window_params = [{transform_indices = @transform_0, window_bounds = array<i64: 8, 768>}, {transform_indices = @transform_1, window_bounds = array<i64: 8, 768>}]} {
    %c0 = arith.constant 0 : index
    %c0_0 = arith.constant 0 : index
    %0 = vector.load %arg1[%c0, %c0_0] : memref<8x768xf32, #tpu.memory_space<vmem>>, vector<8x768xf32>
    %1 = arith.mulf %0, %0 : vector<8x768xf32>
    %cst = arith.constant dense<0.000000e+00> : vector<8xf32>
    %2 = vector.multi_reduction <add>, %1, %cst [1] : vector<8x768xf32> to vector<8xf32>
    %3 = vector.shape_cast %2 : vector<8xf32> to vector<8x1xf32>
    %cst_1 = arith.constant 1.000000e-24 : f32
    %4 = vector.broadcast %cst_1 : f32 to vector<8x1xf32>
    %5 = arith.maximumf %3, %4 : vector<8x1xf32>
    %6 = math.rsqrt %5 : vector<8x1xf32>
    %7 = vector.broadcast %6 : vector<8x1xf32> to vector<8x768xf32>
    %8 = arith.mulf %0, %7 : vector<8x768xf32>
    %c0_2 = arith.constant 0 : index
    %c0_3 = arith.constant 0 : index
    %9 = vector.load %arg2[%c0_2, %c0_3] : memref<8x768xf32, #tpu.memory_space<vmem>>, vector<8x768xf32>
    tpu.vector_store %arg2[%c0_2, %c0_3], %8 {strides = array<i32>} : memref<8x768xf32, #tpu.memory_space<vmem>>, vector<8x768xf32>,
    return
  }
  func.func @transform_0(%arg0: i32) -> (i32, i32) {
    %c0_i32 = arith.constant 0 : i32
    %c0_i32_0 = arith.constant 0 : i32
    return %arg0, %c0_i32 : i32, i32
  }
  func.func @transform_1(%arg0: i32) -> (i32, i32) {
    %c0_i32 = arith.constant 0 : i32
    %c0_i32_0 = arith.constant 0 : i32
    return %arg0, %c0_i32 : i32, i32
  }
}

</mosaic_0001>

<bundles_post_ra>
// kernel: l2_normalize.1
= control target key start
LH: loop header
LB: loop body
LE: loop exit
PB: predicated region body
PF: predicated region fallthrough
CT: control target
= control target key end

     0   :  { %6 = vsyncpa [#allocation3], 0  ;;  %s156_s0 = inlined_call_operand.hbm [shape: f32[8,768], index: 0, kind: input, shape index: {}]   ;;  %s157_s1 = inlined_call_operand.hbm [shape: f32[8,768], index: 1, kind: output, shape index: {}]  }
   0x1   :  { %7 = vsyncpa [#allocation4], 0  ;;  %s13_s8 = sshll.u32 %s156_s0, 4  ;;  %s138_s9 = smov [#allocation2]   ;;  %s14_s8 = int_to_ptr.hbm [resolvable:$true] %s13_s8 }
   0x2   :  { %s15_s10 = sshll.u32 %s138_s9, 4  ;;  %s16_s10 = int_to_ptr.vmem [resolvable:$true] %s15_s10 }
   0x3   :  { %18 = dma.hbm_to_vmem [thread:$0]  %s14_s8, 768, %s16_s10, [#allocation3]  }
   0x4   :  { %134 = dma.done.wait [#allocation3], 768  }
   0x5   :  { %135 = vsyncadd [#allocation3], 4294966528  ;;  %v23_v0 = vld [vmem:[#allocation2] sm:$0xff]  ;;  %v24_v1 = vld [vmem:[#allocation2 + $0x8] sm:$0xff]  ;;  %s139_s0 = smov [#allocation5]   ;;  %s72_s14 = sshll.u32 %s157_s1, 4  ;;  %s73_s14 = int_to_ptr.hbm [resolvable:$true] %s72_s14 }
   0x6   :  { %v25_v2 = vld [vmem:[#allocation2 + $0x10] sm:$0xff]  ;;  %v26_v3 = vld [vmem:[#allocation2 + $0x18] sm:$0xff]  ;;  %v29_v4 = vmul.f32 %v23_v0, %v23_v0  ;;  %v30_v5 = vmul.f32 %v24_v1, %v24_v1  ;;  %v27_v7 = vld [vmem:[#allocation2 + $0x20] sm:$0xff]  ;;  %s70_s11 = sshll.u32 %s139_s0, 4  ;;  %s71_s11 = int_to_ptr.vmem [resolvable:$true] %s70_s11 }
   0x7   :  { %v31_v6 = vmul.f32 %v25_v2, %v25_v2  ;;  %v32_v8 = vmul.f32 %v26_v3, %v26_v3  ;;  %v28_v10 = vld [vmem:[#allocation2 + $0x28] sm:$0xff]  ;;  %v33_v11 = vmul.f32 %v27_v7, %v27_v7 }
   0x8   :  { %v35_v9 = vadd.f32 %v30_v5, %v29_v4  ;;  %v34_v13 = vmul.f32 %v28_v10, %v28_v10 }
   0xa   :  { %v36_v12 = vadd.f32 %v35_v9, %v31_v6 }
   0xc   :  { %v37_v14 = vadd.f32 %v36_v12, %v32_v8 }
   0xe   :  { %v38_v15 = vadd.f32 %v37_v14, %v33_v11 }
  0x10   :  { %v39_v16 = vadd.f32 %v38_v15, %v34_v13 }
  0x12   :  { %40 = vadd.xlane.f32.xlu0 %v39_v16 }
  0x85   :  { %v41_v17 = vpop.xlane.xlu0 %40 }
  0x86   :  { %v42_v18 = vmax.f32 %v41_v17, 1e-24 }
  0x88   :  { %84 = vrsqrt.f32 %v42_v18  ;;  %vm49_vm1 = vweird.f32 %v42_v18 }
  0x8e   :  { %v85_v19 = vpop.eup %84 }
  0x8f   :  { %v44_v20 = vmul.f32 %v85_v19, %v42_v18  ;;  %vm50_vm0 = vweird.f32 %v85_v19 }
  0x90   :  { %vm51_vm2 = vmor %vm49_vm1, %vm50_vm0 }
  0x91   :  { %v45_v21 = vmul.f32 %v85_v19, %v44_v20 }
  0x93   :  { %v46_v22 = vmul.f32 0.5, %v45_v21 }
  0x95   :  { %v47_v23 = vsub.f32 1.5, %v46_v22 }
  0x97   :  { %v48_v24 = vmul.f32 %v85_v19, %v47_v23 }
  0x99   :  { %v52_v25 = vsel %vm51_vm2, %v85_v19, %v48_v24 }
  0x9a   :  { %v53_v26 = vmul.f32 %v52_v25, %v23_v0  ;;  %v54_v27 = vmul.f32 %v52_v25, %v24_v1  ;;  %v55_v28 = vmul.f32 %v52_v25, %v25_v2  ;;  %v56_v29 = vmul.f32 %v52_v25, %v26_v3 }
  0x9b   :  { %v57_v30 = vmul.f32 %v52_v25, %v27_v7  ;;  %v58_v31 = vmul.f32 %v52_v25, %v28_v10 }
  0x9c   :  { %59 = vst [vmem:[#allocation5] sm:$0xff] %v53_v26 }
  0x9d   :  { %60 = vst [vmem:[#allocation5 + $0x8] sm:$0xff] %v54_v27 }
  0x9e   :  { %61 = vst [vmem:[#allocation5 + $0x10] sm:$0xff] %v55_v28 }
  0x9f   :  { %62 = vst [vmem:[#allocation5 + $0x18] sm:$0xff] %v56_v29 }
  0xa0   :  { %63 = vst [vmem:[#allocation5 + $0x20] sm:$0xff] %v57_v30 }
  0xa1   :  { %64 = vst [vmem:[#allocation5 + $0x28] sm:$0xff] %v58_v31 }
  0xa2   :  { %75 = dma.vmem_to_hbm [thread:$0]  %s71_s11, 768, %s73_s14, [#allocation4]  }
  0xa3   :  { %136 = dma.done.wait [#allocation4], 768  }
  0xa4   :  { %137 = vsyncadd [#allocation4], 4294966528 }
  0xa5   :  { %80 = vsyncpa [#allocation3], 1 }
  0xa6   :  { %81 = vsyncpa [#allocation4], 1 }

</bundles_post_ra>
